<compile_context>
chip_gen: v6e
topology: v6e:2x2x1
jax: 0.10.0
libtpu: 0.0.40
codegen_flags: <defaults>
</compile_context>

<pallas_src>
import jax
import jax.numpy as jnp
from jax.experimental import pallas as pl
from jax.experimental.pallas import tpu as pltpu


_EPS = 1e-5


def _layernorm_kernel(x_ref, w_ref, b_ref, o_ref):
    # x_ref : (TILE_ROWS, C)  VMEM block
    # w_ref : (1, C)          VMEM, resident (broadcast over rows)
    # b_ref : (1, C)          VMEM, resident (broadcast over rows)
    x = x_ref[...].astype(jnp.float32)
    inv_c = 1.0 / x.shape[-1]

    # Two-pass mean / variance: matches torch.var(unbiased=False) numerics.
    # The lane reductions are XLU work hidden under the DMA critical path.
    mu = jnp.sum(x, axis=-1, keepdims=True) * inv_c
    xc = x - mu
    var = jnp.sum(xc * xc, axis=-1, keepdims=True) * inv_c

    y = xc * jax.lax.rsqrt(var + _EPS)
    y = y * w_ref[...].astype(jnp.float32) + b_ref[...].astype(jnp.float32)
    o_ref[...] = y.astype(o_ref.dtype)


def _vmem_budgets():
    """Return (tile_budget_bytes, vmem_limit_ceiling) for this TPU generation."""
    try:
        cap = int(pltpu.get_tpu_info().vmem_capacity_bytes)
    except Exception:
        cap = 64 << 20  # be conservative (v7x per-TensorCore VMEM) if unknown
    if cap >= (100 << 20):        # v5e / v6e: 128 MiB physical VMEM
        return 24 << 20, 48 << 20
    return 12 << 20, 36 << 20     # v7x: 64 MiB per TensorCore


def _tile_rows(rows, c, x_bytes, target_block_bytes, tile_budget_bytes,
               min_grid=4):
    """Pick the row-tile size: byte-targeted, VMEM-budgeted, sublane-aligned."""
    # Sublane multiple for the second-to-last block dim: 8 for 32-bit,
    # 16 for 16-bit, 32 for 8-bit dtypes.
    sublane = max(8, 32 // max(1, x_bytes))
    if rows <= sublane:
        # Single (partial) block; block dim equals the full array extent.
        return rows

    row_in_bytes = c * x_bytes
    # Per-row VMEM cost: 2x double-buffered input + 2x double-buffered output
    # + ~5 f32 elementwise temporaries (x upcast, xc, xc*xc, y, slack).  The
    # temporaries are what the old version under-counted for bf16/int8 inputs.
    row_total_bytes = 4 * row_in_bytes + 5 * c * 4

    tr = max(sublane, target_block_bytes // row_in_bytes)
    tr = min(tr, max(sublane, tile_budget_bytes // row_total_bytes))
    # Keep >= min_grid grid steps when rows allow it (v7x megacore needs >= 2
    # steps per core; also keeps the pipeline overlapping on v5e/v6e).
    if rows // min_grid >= sublane:
        tr = min(tr, rows // min_grid)
    tr = max(sublane, (tr // sublane) * sublane)
    # Never let the block exceed the array extent in the row dimension; the
    # remainder becomes a masked partial last block.
    tr = min(tr, (rows // sublane) * sublane)
    return tr


def with_bias_layer_norm(x, weight, bias, *, target_block_bytes=4 << 20):
    """LayerNorm over the last axis of x, matching WithBias_LayerNorm.forward."""
    orig_shape = x.shape
    c = orig_shape[-1]
    rows = 1
    for d in orig_shape[:-1]:
        rows *= d
    x2 = x.reshape(rows, c)          # contiguous reshape: free
    w2 = weight.reshape(1, c)
    b2 = bias.reshape(1, c)

    x_bytes = jnp.dtype(x.dtype).itemsize
    p_bytes = jnp.dtype(weight.dtype).itemsize

    tile_budget_bytes, vmem_ceiling = _vmem_budgets()
    tr = _tile_rows(rows, c, x_bytes, target_block_bytes, tile_budget_bytes)
    grid = (pl.cdiv(rows, tr),)       # partial last block handled by Pallas

    # Scoped-VMEM limit: pipeline buffers + f32 temporaries + params + margin.
    buf_bytes = 4 * tr * c * x_bytes + 5 * tr * c * 4 + 4 * c * p_bytes
    vmem_limit = int(min(vmem_ceiling, max(16 << 20, buf_bytes + (4 << 20))))

    cost = pl.CostEstimate(
        flops=int(9 * rows * c),
        transcendentals=int(rows),                      # one rsqrt per row
        bytes_accessed=int(2 * rows * c * x_bytes + 2 * c * p_bytes),
    )

    out = pl.pallas_call(
        _layernorm_kernel,
        out_shape=jax.ShapeDtypeStruct((rows, c), x.dtype),
        grid_spec=pltpu.PrefetchScalarGridSpec(
            num_scalar_prefetch=0,
            grid=grid,
            in_specs=[
                pl.BlockSpec((tr, c), lambda i: (i, 0)),
                pl.BlockSpec((1, c), lambda i: (0, 0)),
                pl.BlockSpec((1, c), lambda i: (0, 0)),
            ],
            out_specs=pl.BlockSpec((tr, c), lambda i: (i, 0)),
        ),
        compiler_params=pltpu.CompilerParams(
            dimension_semantics=("parallel",),
            vmem_limit_bytes=vmem_limit,
        ),
        cost_estimate=cost,
    )(x2, w2, b2)

    return out.reshape(orig_shape)


def _reference(x, weight, bias):
    mu = jnp.mean(x, axis=-1, keepdims=True)
    var = jnp.mean((x - mu) ** 2, axis=-1, keepdims=True)
    return (x - mu) / jnp.sqrt(var + _EPS) * weight + bias


if __name__ == "__main__":
    key = jax.random.PRNGKey(0)
    kx1, kx2, kx3, kw, kb = jax.random.split(key, 5)

    # Shapes consistent with how this module is used in Restormer-style code:
    # tokens of shape (B, H*W, C), normalized over C.
    C = 32
    weight = jnp.ones((C,), jnp.float32) + 0.1 * jax.random.normal(kw, (C,), jnp.float32)
    bias = jnp.zeros((C,), jnp.float32) + 0.1 * jax.random.normal(kb, (C,), jnp.float32)

    # 1) Row count divisible by the tile.
    x1 = jax.random.normal(kx1, (2, 64, C), dtype=jnp.float32)
    o1 = jax.block_until_ready(with_bias_layer_norm(x1, weight, bias))
    assert jnp.allclose(o1, _reference(x1, weight, bias), atol=1e-5, rtol=1e-5), \
        "mismatch vs reference (even rows)"

    # 2) Row count NOT divisible by the tile -> exercises the no-pad partial
    #    last block (masked OOB stores).
    x2 = jax.random.normal(kx2, (3, 37, C), dtype=jnp.float32)
    o2 = jax.block_until_ready(with_bias_layer_norm(x2, weight, bias))
    assert jnp.allclose(o2, _reference(x2, weight, bias), atol=1e-5, rtol=1e-5), \
        "mismatch vs reference (partial last block)"

    # 3) Lane-dense config (C = 128) with a partial last block.
    C3 = 128
    w3 = jnp.ones((C3,), jnp.float32) + 0.1 * jax.random.normal(kw, (C3,), jnp.float32)
    b3 = jnp.zeros((C3,), jnp.float32) + 0.1 * jax.random.normal(kb, (C3,), jnp.float32)
    x3 = jax.random.normal(kx3, (2, 37, C3), dtype=jnp.float32)
    o3 = jax.block_until_ready(with_bias_layer_norm(x3, w3, b3))
    assert jnp.allclose(o3, _reference(x3, w3, b3), atol=1e-5, rtol=1e-5), \
        "mismatch vs reference (lane-dense)"

    print("KERNEL_OK")
</pallas_src>

<mosaic_0001>
module attributes {stable_mosaic.version = 11 : i64} {
  func.func @_layernorm_kernel(%arg0: i32, %arg1: memref<32x32xf32, #tpu.memory_space<vmem>>, %arg2: memref<1x32xf32, #tpu.memory_space<vmem>>, %arg3: memref<1x32xf32, #tpu.memory_space<vmem>>, %arg4: memref<32x32xf32, #tpu.memory_space<vmem>>) attributes {dimension_semantics = [#tpu.dimension_semantics<parallel>], iteration_bounds = array<i64: 4>, scalar_prefetch = 0 : i64, scratch_operands = 0 : i64, tpu.core_type = #tpu.core_type<tc>, window_params = [{transform_indices = @transform_0, window_bounds = array<i64: 32, 32>}, {pipeline_mode = #tpu.pipeline_mode<synchronous>, transform_indices = @transform_1, window_bounds = array<i64: 1, 32>}, {pipeline_mode = #tpu.pipeline_mode<synchronous>, transform_indices = @transform_2, window_bounds = array<i64: 1, 32>}, {transform_indices = @transform_3, window_bounds = array<i64: 32, 32>}]} {
    %c0 = arith.constant 0 : index
    %c0_0 = arith.constant 0 : index
    %0 = vector.load %arg1[%c0, %c0_0] : memref<32x32xf32, #tpu.memory_space<vmem>>, vector<32x32xf32>
    %cst = arith.constant dense<0.000000e+00> : vector<32xf32>
    %1 = vector.multi_reduction <add>, %0, %cst [1] : vector<32x32xf32> to vector<32xf32>
    %2 = vector.shape_cast %1 : vector<32xf32> to vector<32x1xf32>
    %cst_1 = arith.constant 3.125000e-02 : f32
    %3 = vector.broadcast %cst_1 : f32 to vector<32x1xf32>
    %4 = arith.mulf %2, %3 : vector<32x1xf32>
    %5 = vector.broadcast %4 : vector<32x1xf32> to vector<32x32xf32>
    %6 = arith.subf %0, %5 : vector<32x32xf32>
    %7 = arith.mulf %6, %6 : vector<32x32xf32>
    %cst_2 = arith.constant dense<0.000000e+00> : vector<32xf32>
    %8 = vector.multi_reduction <add>, %7, %cst_2 [1] : vector<32x32xf32> to vector<32xf32>
    %9 = vector.shape_cast %8 : vector<32xf32> to vector<32x1xf32>
    %cst_3 = arith.constant 3.125000e-02 : f32
    %10 = vector.broadcast %cst_3 : f32 to vector<32x1xf32>
    %11 = arith.mulf %9, %10 : vector<32x1xf32>
    %cst_4 = arith.constant 9.99999974E-6 : f32
    %12 = vector.broadcast %cst_4 : f32 to vector<32x1xf32>
    %13 = arith.addf %11, %12 : vector<32x1xf32>
    %14 = math.rsqrt %13 : vector<32x1xf32>
    %15 = vector.broadcast %14 : vector<32x1xf32> to vector<32x32xf32>
    %16 = arith.mulf %6, %15 : vector<32x32xf32>
    %c0_5 = arith.constant 0 : index
    %c0_6 = arith.constant 0 : index
    %17 = vector.load %arg2[%c0_5, %c0_6] : memref<1x32xf32, #tpu.memory_space<vmem>>, vector<1x32xf32>
    %18 = vector.broadcast %17 : vector<1x32xf32> to vector<32x32xf32>
    %19 = arith.mulf %16, %18 : vector<32x32xf32>
    %c0_7 = arith.constant 0 : index
    %c0_8 = arith.constant 0 : index
    %20 = vector.load %arg3[%c0_7, %c0_8] : memref<1x32xf32, #tpu.memory_space<vmem>>, vector<1x32xf32>
    %21 = vector.broadcast %20 : vector<1x32xf32> to vector<32x32xf32>
    %22 = arith.addf %19, %21 : vector<32x32xf32>
    %c0_9 = arith.constant 0 : index
    %c0_10 = arith.constant 0 : index
    %23 = vector.load %arg4[%c0_9, %c0_10] : memref<32x32xf32, #tpu.memory_space<vmem>>, vector<32x32xf32>
    tpu.vector_store %arg4[%c0_9, %c0_10], %22 {strides = array<i32>} : memref<32x32xf32, #tpu.memory_space<vmem>>, vector<32x32xf32>,
    return
  }
  func.func @transform_0(%arg0: i32) -> (i32, i32) {
    %c0_i32 = arith.constant 0 : i32
    %c0_i32_0 = arith.constant 0 : i32
    return %arg0, %c0_i32 : i32, i32
  }
  func.func @transform_1(%arg0: i32) -> (i32, i32) {
    %c0_i32 = arith.constant 0 : i32
    %c0_i32_0 = arith.constant 0 : i32
    %c0_i32_1 = arith.constant 0 : i32
    return %c0_i32, %c0_i32_0 : i32, i32
  }
  func.func @transform_2(%arg0: i32) -> (i32, i32) {
    %c0_i32 = arith.constant 0 : i32
    %c0_i32_0 = arith.constant 0 : i32
    %c0_i32_1 = arith.constant 0 : i32
    return %c0_i32, %c0_i32_0 : i32, i32
  }
  func.func @transform_3(%arg0: i32) -> (i32, i32) {
    %c0_i32 = arith.constant 0 : i32
    %c0_i32_0 = arith.constant 0 : i32
    return %arg0, %c0_i32 : i32, i32
  }
}

</mosaic_0001>

<bundles_post_ra>
// kernel: tpu_custom_call.1
= control target key start
LH: loop header
LB: loop body
LE: loop exit
PB: predicated region body
PF: predicated region fallthrough
CT: control target
= control target key end

     0   :  { %s370_s12 = smov 0   ;;  %s412_s0 = inlined_call_operand.vmem [shape: f32[128,32], index: 0, kind: input, shape index: {}]   ;;  %s413_s1 = inlined_call_operand.vmem [shape: f32[1,32], index: 1, kind: input, shape index: {}]   ;;  %s414_s2 = inlined_call_operand.vmem [shape: f32[1,32], index: 2, kind: input, shape index: {}]   ;;  %s415_s3 = inlined_call_operand.vmem [shape: f32[128,32], index: 3, kind: output, shape index: {}]  }
   0x1 LB: > { %s313_s13 = sadd.s32 4294967295, %s348_s12   ;;  %p317_p0 = scmp.ge.s32.totalorder %s348_s12, 1  ;;  %s348_s12 = sphi %s370_s12, %s13_s12  }
   0x2   : > { %p138_p1 = scmp.lt.s32.totalorder %s348_s12, 5 }
   0x4   : > { %p139_p2 = pnand %p317_p0, %p138_p1 }
   0x5   : > { %s318_s14 = sshll.u32 (!%p139_p2), %s313_s13, 2 }
   0x6   : > { %142 = sbr.rel (%p139_p2) target bundleno = 332 (0x14c), region = 32  ;;  %p163_p3 = scmp.lt.s32.totalorder (!%p139_p2), %s318_s14, 15 }
   0xb   : > { %s417_s14 = smov (!%p163_p3, %s318_s14), 15  ;;  %vm178_vm0 = vcmask 261120   ;;  %v322_v41 = vld [vmem:[%s413_s1] ss:$0 sm:$0xff] }
   0xc   : > { %s319_s15 = sshll.u32 %s417_s14, 3  ;;  %v323_v43 = vld [vmem:[%s414_s2] ss:$0 sm:$0xff] }
   0xd   : > { %s166_s18 = scalar_lea.vmem %s412_s0, %s319_s15  ;;  %s172_s25 = scalar_lea.vmem %s415_s3, %s319_s15 }
   0xe   : > { %v174_v0 = vld [vmem:[%s166_s18] sm:$0xff]  ;;  %v176_v1 = vld [vmem:[%s166_s18 + $0x10] sm:$0xff]  ;;  %v175_v2 = vld [vmem:[%s166_s18 + $0x8] sm:$0xff] }
   0xf   : > { %v179_v3 = vsel %vm178_vm0, %v174_v0, 0.0  ;;  %v185_v4 = vsel %vm178_vm0, %v176_v1, 0.0  ;;  %v177_v5 = vld [vmem:[%s166_s18 + $0x18] sm:$0xff]  ;;  %v182_v6 = vsel %vm178_vm0, %v175_v2, 0.0 }
  0x10   : > { %180 = vadd.xlane.f32.xlu0 %v179_v3  ;;  %186 = vadd.xlane.f32.xlu1 %v185_v4  ;;  %v188_v7 = vsel %vm178_vm0, %v177_v5, 0.0 }
  0x14   : > { %183 = vadd.xlane.f32.xlu0 %v182_v6  ;;  %189 = vadd.xlane.f32.xlu1 %v188_v7 }
  0x99   : > { %v181_v8 = vpop.xlane.xlu0 %180  ;;  %v187_v9 = vpop.xlane.xlu1 %186 }
  0x9a   : > { %v191_v10 = vmul.f32 0.03125, %v181_v8  ;;  %v193_v11 = vmul.f32 0.03125, %v187_v9 }
  0x9c   : > { %v195_v12 = vsub.f32 %v174_v0, %v191_v10  ;;  %v197_v13 = vsub.f32 %v176_v1, %v193_v11 }
  0x9d   : > { %v184_v14 = vpop.xlane.xlu0 %183  ;;  %v190_v15 = vpop.xlane.xlu1 %189 }
  0x9e   : > { %v192_v16 = vmul.f32 0.03125, %v184_v14  ;;  %v194_v17 = vmul.f32 0.03125, %v190_v15  ;;  %v199_v18 = vmul.f32 %v195_v12, %v195_v12  ;;  %v201_v19 = vmul.f32 %v197_v13, %v197_v13 }
  0xa0   : > { %v196_v20 = vsub.f32 %v175_v2, %v192_v16  ;;  %v198_v21 = vsub.f32 %v177_v5, %v194_v17  ;;  %v203_v22 = vsel %vm178_vm0, %v199_v18, 0.0  ;;  %v209_v23 = vsel %vm178_vm0, %v201_v19, 0.0 }
  0xa1   : > { %204 = vadd.xlane.f32.xlu0 %v203_v22 }
  0xa2   : > { %v200_v24 = vmul.f32 %v196_v20, %v196_v20  ;;  %v202_v25 = vmul.f32 %v198_v21, %v198_v21 }
  0xa4   : > { %v206_v26 = vsel %vm178_vm0, %v200_v24, 0.0  ;;  %v212_v27 = vsel %vm178_vm0, %v202_v25, 0.0 }
  0xa5   : > { %210 = vadd.xlane.f32.xlu0 %v209_v23  ;;  %207 = vadd.xlane.f32.xlu1 %v206_v26 }
  0xa9   : > { %213 = vadd.xlane.f32.xlu1 %v212_v27 }
 0x12a   : > { %v205_v28 = vpop.xlane.xlu0 %204 }
 0x12b   : > { %v215_v29 = vmul.f32 0.03125, %v205_v28 }
 0x12d   : > { %v219_v30 = vadd.f32 1e-05, %v215_v29 }
 0x12e   : > { %v208_v31 = vpop.xlane.xlu1 %207  ;;  %v211_v32 = vpop.xlane.xlu0 %210 }
 0x12f   : > { %334 = vrsqrt.f32 %v219_v30  ;;  %v216_v33 = vmul.f32 0.03125, %v208_v31  ;;  %v217_v34 = vmul.f32 0.03125, %v211_v32 }
 0x131   : > { %v220_v35 = vadd.f32 1e-05, %v216_v33  ;;  %v221_v36 = vadd.f32 1e-05, %v217_v34 }
 0x132   : > { %v214_v37 = vpop.xlane.xlu1 %213 }
 0x133   : > { %336 = vrsqrt.f32 %v220_v35  ;;  %v218_v38 = vmul.f32 0.03125, %v214_v37 }
 0x134   : > { %338 = vrsqrt.f32 %v221_v36 }
 0x135   : > { %v222_v39 = vadd.f32 1e-05, %v218_v38 }
 0x137   : > { %340 = vrsqrt.f32 %v222_v39 }
 0x13c   : > { %v335_v40 = vpop.eup %334 }
 0x13d   : > { %v227_v42 = vmul.f32 %v335_v40, %v195_v12 }
 0x13f   : > { %v238_v44 = vmul.f32 %v322_v41, %v227_v42 }
 0x140   : > { %v337_v45 = vpop.eup %336 }
 0x141   : > { %v339_v46 = vpop.eup %338  ;;  %v249_v47 = vadd.f32 %v323_v43, %v238_v44  ;;  %v228_v48 = vmul.f32 %v337_v45, %v196_v20 }
 0x142   : > { %v229_v49 = vmul.f32 %v339_v46, %v197_v13 }
 0x143   : > { %253 = vst.msk [vmem:[%s172_s25] sm:$0xff] %vm178_vm0, %v249_v47  ;;  %v239_v50 = vmul.f32 %v322_v41, %v228_v48 }
 0x144   : > { %v341_v51 = vpop.eup %340  ;;  %v240_v52 = vmul.f32 %v322_v41, %v229_v49 }
 0x145   : > { %v250_v53 = vadd.f32 %v323_v43, %v239_v50  ;;  %v230_v54 = vmul.f32 %v341_v51, %v198_v21 }
 0x146   : > { %v251_v55 = vadd.f32 %v323_v43, %v240_v52 }
 0x147   : > { %254 = vst.msk [vmem:[%s172_s25 + $0x8] sm:$0xff] %vm178_vm0, %v250_v53  ;;  %v241_v56 = vmul.f32 %v322_v41, %v230_v54 }
 0x148   : > { %255 = vst.msk [vmem:[%s172_s25 + $0x10] sm:$0xff] %vm178_vm0, %v251_v55 }
 0x149   : > { %v252_v57 = vadd.f32 %v323_v43, %v241_v56 }
 0x14b   : > { %256 = vst.msk [vmem:[%s172_s25 + $0x18] sm:$0xff] %vm178_vm0, %v252_v57 }
 0x14c PF: > { %s13_s12 = sadd.s32 1, %s348_s12  }
 0x14d   : > { %p10_p4 = scmp.ge.s32.totalorder %s13_s12, 6  }
 0x14f   :  { %12 = sbr.rel (!%p10_p4) target bundleno = 1 (0x1), region = 62 }

</bundles_post_ra>
